<compile_context>
chip_gen: v7x
topology: tpu7x:2x2x1
jax: 0.10.0
libtpu: 0.0.40
codegen_flags: <defaults>
</compile_context>

<pallas_src>
import functools

import jax
import jax.numpy as jnp
from jax import lax
from jax.experimental import pallas as pl
from jax.experimental.pallas import tpu as pltpu

_LANES = 128
_SUBLANES = 8
_MAX_BLOCK_ROWS = 8192   # 8192 * 128 * 4 B = 4 MiB per input per pipeline buffer
_CHUNK_ROWS = 256        # in-kernel sub-chunk -> ~128 KiB live temporaries


def _round_up(x, m):
    return (x + m - 1) // m * m


def _cdiv(a, b):
    return (a + b - 1) // b


def _num_tensorcores():
    # v7x has 2 TensorCores per chip; v5e/v6e have 1.  Gating n_par avoids a
    # useless grid partition (second accumulator + duplicate block) there.
    try:
        kind = jax.devices()[0].device_kind.lower()
    except Exception:
        return 1
    return 2 if "v7" in kind else 1


def _kl_sum_kernel(a_ref, b_ref, o_ref, *, rows_total, block_rows, chunk_rows,
                   n_chunks, n_seq):
    # o_ref (8,128) stays resident across the reduction ("arbitrary") axis.
    @pl.when(pl.program_id(1) == 0)
    def _():
        o_ref[...] = jnp.zeros_like(o_ref)

    # UNclamped block index: the mask below zeroes out any overshoot rows
    # (ragged last block / clamped duplicate block), whose VMEM contents are
    # unspecified for BOTH a and b.
    block_idx = pl.program_id(0) * n_seq + pl.program_id(1)
    row0 = block_idx * block_rows

    # Hoisted out of the chunk loop (JAX does not CSE broadcast_in_dim).
    local_row = lax.broadcasted_iota(jnp.int32, (chunk_rows, _LANES), 0)

    def chunk_body(c, acc):
        r = pl.multiple_of(c * chunk_rows, chunk_rows)
        a = a_ref[pl.ds(r, chunk_rows), :]
        b = b_ref[pl.ds(r, chunk_rows), :]
        valid = (row0 + r + local_row) < rows_total
        # Keep `a *` inside the where (0*log(0/b) = NaN in the discarded
        # branch) and keep log(a/b) un-split (a<0,b<0 must stay finite).
        contrib = jnp.where(jnp.logical_and(valid, a != 0.0),
                            a * jnp.log(a / b), 0.0)
        # (chunk,128) -> (chunk/8, 8, 128) is a tile-preserving regroup; the
        # axis-0 sum is plain vector adds into one vreg-sized partial.
        part = jnp.sum(
            contrib.reshape(chunk_rows // _SUBLANES, _SUBLANES, _LANES), axis=0)
        return acc + part

    acc = lax.fori_loop(0, n_chunks, chunk_body,
                        jnp.zeros((_SUBLANES, _LANES), jnp.float32))
    o_ref[...] += acc


def kl_div_loss(input1, input2):
    """sum(where(a != 0, a * log(a / b), 0)) over all elements -> shape (1,)."""
    a = input1.reshape(-1).astype(jnp.float32)
    b = input2.reshape(-1).astype(jnp.float32)
    total = a.shape[0]

    # Pad only when total isn't a multiple of 128 (or smaller than one (8,128)
    # tile).  Dead code for the module's (2,3,224,224) shape -> no extra HBM
    # pass; the kernel reads the original bytes directly.
    padded = max(_round_up(total, _LANES), _SUBLANES * _LANES)
    if padded != total:
        a = jnp.pad(a, (0, padded - total))                      # zeros: masked by a != 0
        b = jnp.pad(b, (0, padded - total), constant_values=1.0)
    rows = padded // _LANES
    a2 = a.reshape(rows, _LANES)   # contiguous reshape: layout-only, no copy
    b2 = b.reshape(rows, _LANES)

    # Grid shaped to the data.
    n_par = _num_tensorcores() if rows >= 1024 else 1
    per_part = _cdiv(rows, n_par)
    block_rows = min(_MAX_BLOCK_ROWS, _round_up(per_part, _SUBLANES))
    chunk_rows = min(_CHUNK_ROWS, block_rows)        # multiple of 8
    block_rows = _round_up(block_rows, chunk_rows)   # divisible by chunk
    n_blocks = _cdiv(rows, block_rows)
    n_seq = _cdiv(n_blocks, n_par)
    n_chunks = block_rows // chunk_rows

    kernel = functools.partial(
        _kl_sum_kernel, rows_total=rows, block_rows=block_rows,
        chunk_rows=chunk_rows, n_chunks=n_chunks, n_seq=n_seq)

    def in_map(p, i):
        # Clamp so a possible overshoot block (odd n_blocks with n_par=2) never
        # maps outside the array; the kernel's row mask zeroes its contribution.
        return (jnp.minimum(p * n_seq + i, n_blocks - 1), 0)

    partials = pl.pallas_call(
        kernel,
        out_shape=jax.ShapeDtypeStruct((n_par * _SUBLANES, _LANES), jnp.float32),
        grid=(n_par, n_seq),
        in_specs=[
            pl.BlockSpec((block_rows, _LANES), in_map),
            pl.BlockSpec((block_rows, _LANES), in_map),
        ],
        out_specs=pl.BlockSpec((_SUBLANES, _LANES), lambda p, i: (p, 0)),
        compiler_params=pltpu.CompilerParams(
            # TODO(synk): if plain "parallel" doesn't engage both v7x
            # TensorCores on a given toolchain, switch dim 0 to
            # pltpu.CORE_PARALLEL.
            dimension_semantics=("parallel", "arbitrary"),
            vmem_limit_bytes=48 * 1024 * 1024,
        ),
    )(a2, b2)

    # Final tiny reduction (<= 2048 floats) + PyTorch's (1,) output shape.
    return jnp.sum(partials).reshape(1)


if __name__ == "__main__":
    key = jax.random.PRNGKey(0)
    k1, k2 = jax.random.split(key)
    shape = (2, 3, 32, 32)  # small stand-in for the module's (2, 3, 224, 224)

    # Positive inputs keep log(a/b) finite (KL-style usage).
    input1 = jnp.abs(jax.random.normal(k1, shape, dtype=jnp.float32)) + 0.05
    input2 = jnp.abs(jax.random.normal(k2, shape, dtype=jnp.float32)) + 0.05
    # Exact zeros in `a` exercise the where(a != 0, ..., 0) branch.
    input1 = input1.at[0, 0, :2, :].set(0.0)
    # A matched negative region exercises log(a/b) with a<0, b<0 (finite).
    input1 = input1.at[1, 2, :4, :].multiply(-1.0)
    input2 = input2.at[1, 2, :4, :].multiply(-1.0)

    loss = jax.jit(kl_div_loss)(input1, input2)
    loss = jax.block_until_ready(loss)

    # Pure-JAX reference of the numpy formula in the PyTorch module.
    ref = jnp.sum(jnp.where(input1 != 0.0,
                            input1 * jnp.log(input1 / input2), 0.0))

    assert loss.shape == (1,), loss.shape
    assert loss.dtype == jnp.float32, loss.dtype
    assert jnp.allclose(loss[0], ref, rtol=1e-4, atol=1e-2), (loss, ref)
    print("KERNEL_OK")
</pallas_src>

<mosaic_0001>
module attributes {stable_mosaic.version = 11 : i64} {
  func.func @_kl_sum_kernel(%arg0: i32, %arg1: i32, %arg2: memref<48x128xf32, #tpu.memory_space<vmem>>, %arg3: memref<48x128xf32, #tpu.memory_space<vmem>>, %arg4: memref<8x128xf32, #tpu.memory_space<vmem>>) attributes {dimension_semantics = [#tpu.dimension_semantics<parallel>, #tpu.dimension_semantics<arbitrary>], iteration_bounds = array<i64: 1, 1>, scalar_prefetch = 0 : i64, scratch_operands = 0 : i64, tpu.core_type = #tpu.core_type<tc>, window_params = [{transform_indices = @transform_0, window_bounds = array<i64: 48, 128>}, {transform_indices = @transform_1, window_bounds = array<i64: 48, 128>}, {transform_indices = @transform_2, window_bounds = array<i64: 8, 128>}]} {
    %c0_i32 = arith.constant 0 : i32
    %0 = arith.cmpi eq, %arg1, %c0_i32 : i32
    %1 = arith.extui %0 : i1 to i32
    %c0_i32_0 = arith.constant 0 : i32
    %2 = arith.cmpi ne, %1, %c0_i32_0 : i32
    scf.if %2 {
      %cst_13 = arith.constant 0.000000e+00 : f32
      %33 = vector.broadcast %cst_13 : f32 to vector<8x128xf32>
      %c0_14 = arith.constant 0 : index
      %c0_15 = arith.constant 0 : index
      %34 = vector.load %arg4[%c0_14, %c0_15] : memref<8x128xf32, #tpu.memory_space<vmem>>, vector<8x128xf32>
      tpu.vector_store %arg4[%c0_14, %c0_15], %33 {strides = array<i32>} : memref<8x128xf32, #tpu.memory_space<vmem>>, vector<8x128xf32>,
    } else {
    }
    %c1_i32 = arith.constant 1 : i32
    %3 = arith.muli %arg0, %c1_i32 : i32
    %4 = arith.addi %3, %arg1 : i32
    %c48_i32 = arith.constant 48 : i32
    %5 = arith.muli %4, %c48_i32 : i32
    %6 = tpu.iota {dimensions = array<i32: 0>} : vector<48x128xi32>
    %cst = arith.constant 0.000000e+00 : f32
    %7 = vector.broadcast %cst : f32 to vector<8x128xf32>
    %c0_i32_1 = arith.constant 0 : i32
    %c48_i32_2 = arith.constant 48 : i32
    %8 = arith.muli %c0_i32_1, %c48_i32_2 : i32
    %9 = tpu.assume_multiple %8, 48 : i32
    %10 = arith.index_cast %9 : i32 to index
    %c0 = arith.constant 0 : index
    %11 = vector.load %arg2[%10, %c0] : memref<48x128xf32, #tpu.memory_space<vmem>>, vector<48x128xf32>
    %12 = arith.index_cast %9 : i32 to index
    %c0_3 = arith.constant 0 : index
    %13 = vector.load %arg3[%12, %c0_3] : memref<48x128xf32, #tpu.memory_space<vmem>>, vector<48x128xf32>
    %14 = arith.addi %5, %9 : i32
    %15 = vector.broadcast %14 : i32 to vector<48x128xi32>
    %16 = arith.addi %15, %6 : vector<48x128xi32>
    %c48_i32_4 = arith.constant 48 : i32
    %17 = vector.broadcast %c48_i32_4 : i32 to vector<48x128xi32>
    %18 = arith.cmpi slt, %16, %17 : vector<48x128xi32>
    %cst_5 = arith.constant 0.000000e+00 : f32
    %19 = vector.broadcast %cst_5 : f32 to vector<48x128xf32>
    %20 = arith.cmpf one, %11, %19 : vector<48x128xf32>
    %21 = arith.andi %18, %20 : vector<48x128xi1>
    %22 = arith.divf %11, %13 : vector<48x128xf32>
    %23 = math.log %22 : vector<48x128xf32>
    %24 = arith.mulf %11, %23 : vector<48x128xf32>
    %cst_6 = arith.constant 0.000000e+00 : f32
    %25 = vector.broadcast %cst_6 : f32 to vector<48x128xf32>
    %26 = arith.select %21, %24, %25 : vector<48x128xi1>, vector<48x128xf32>
    %27 = vector.shape_cast %26 : vector<48x128xf32> to vector<6x8x128xf32>
    %cst_7 = arith.constant dense<0.000000e+00> : vector<8x128xf32>
    %28 = vector.multi_reduction <add>, %27, %cst_7 [0] : vector<6x8x128xf32> to vector<8x128xf32>
    %29 = arith.addf %7, %28 : vector<8x128xf32>
    %c1_i32_8 = arith.constant 1 : i32
    %c0_9 = arith.constant 0 : index
    %c0_10 = arith.constant 0 : index
    %30 = vector.load %arg4[%c0_9, %c0_10] : memref<8x128xf32, #tpu.memory_space<vmem>>, vector<8x128xf32>
    %31 = arith.addf %30, %29 : vector<8x128xf32>
    %c0_11 = arith.constant 0 : index
    %c0_12 = arith.constant 0 : index
    %32 = vector.load %arg4[%c0_11, %c0_12] : memref<8x128xf32, #tpu.memory_space<vmem>>, vector<8x128xf32>
    tpu.vector_store %arg4[%c0_11, %c0_12], %31 {strides = array<i32>} : memref<8x128xf32, #tpu.memory_space<vmem>>, vector<8x128xf32>,
    return
  }
  func.func @transform_0(%arg0: i32, %arg1: i32) -> (i32, i32) {
    %c1_i32 = arith.constant 1 : i32
    %0 = arith.muli %arg0, %c1_i32 : i32
    %1 = arith.addi %0, %arg1 : i32
    %c0_i32 = arith.constant 0 : i32
    %2 = arith.minsi %1, %c0_i32 : i32
    %c0_i32_0 = arith.constant 0 : i32
    %c0_i32_1 = arith.constant 0 : i32
    return %2, %c0_i32_0 : i32, i32
  }
  func.func @transform_1(%arg0: i32, %arg1: i32) -> (i32, i32) {
    %c1_i32 = arith.constant 1 : i32
    %0 = arith.muli %arg0, %c1_i32 : i32
    %1 = arith.addi %0, %arg1 : i32
    %c0_i32 = arith.constant 0 : i32
    %2 = arith.minsi %1, %c0_i32 : i32
    %c0_i32_0 = arith.constant 0 : i32
    %c0_i32_1 = arith.constant 0 : i32
    return %2, %c0_i32_0 : i32, i32
  }
  func.func @transform_2(%arg0: i32, %arg1: i32) -> (i32, i32) {
    %c0_i32 = arith.constant 0 : i32
    %c0_i32_0 = arith.constant 0 : i32
    return %arg0, %c0_i32 : i32, i32
  }
}

</mosaic_0001>

<bundles_post_ra>
// kernel: kl_div_loss.1
= control target key start
LH: loop header
LB: loop body
LE: loop exit
PB: predicated region body
PF: predicated region fallthrough
CT: control target
= control target key end

     0   :  { %s267_s1 = inlined_call_operand.vmem [shape: f32[48,128], index: 1, kind: input, shape index: {}]   ;;  %s268_s0 = inlined_call_operand.vmem [shape: f32[48,128], index: 0, kind: input, shape index: {}]   ;;  %s269_s2 = inlined_call_operand.vmem [shape: f32[8,128], index: 2, kind: output, shape index: {}]  }
   0x1   :  { %v95_v0 = vld [vmem:[%s267_s1] sm:$0xff]  ;;  %v96_v1 = vld [vmem:[%s267_s1 + $0x8] sm:$0xff]  ;;  %v97_v2 = vld [vmem:[%s267_s1 + $0x10] sm:$0xff] }
   0x2   :  { %v98_v3 = vld [vmem:[%s267_s1 + $0x18] sm:$0xff]  ;;  %189 = vrcp.f32 %v95_v0  ;;  %v99_v4 = vld [vmem:[%s267_s1 + $0x20] sm:$0xff]  ;;  %v100_v5 = vld [vmem:[%s267_s1 + $0x28] sm:$0xff] }
   0x3   :  { %191 = vrcp.f32 %v96_v1  ;;  %v89_v6 = vld [vmem:[%s268_s0] sm:$0xff]  ;;  %v90_v7 = vld [vmem:[%s268_s0 + $0x8] sm:$0xff]  ;;  %v91_v9 = vld [vmem:[%s268_s0 + $0x10] sm:$0xff] }
   0x4   :  { %193 = vrcp.f32 %v97_v2  ;;  %v92_v11 = vld [vmem:[%s268_s0 + $0x18] sm:$0xff]  ;;  %v93_v14 = vld [vmem:[%s268_s0 + $0x20] sm:$0xff]  ;;  %v94_v17 = vld [vmem:[%s268_s0 + $0x28] sm:$0xff]  ;;  %vm115_vm0 = vcmp.ne.f32.partialorder %v89_v6, 0.0  ;;  %vm116_vm1 = vcmp.ne.f32.partialorder %v90_v7, 0.0  ;;  %vm117_vm2 = vcmp.ne.f32.partialorder %v91_v9, 0.0 }
   0x5   :  { %195 = vrcp.f32 %v98_v3  ;;  %vm118_vm3 = vcmp.ne.f32.partialorder %v92_v11, 0.0  ;;  %vm119_vm4 = vcmp.ne.f32.partialorder %v93_v14, 0.0  ;;  %vm120_vm5 = vcmp.ne.f32.partialorder %v94_v17, 0.0 }
   0x6   :  { %197 = vrcp.f32 %v99_v4 }
   0x7   :  { %199 = vrcp.f32 %v100_v5 }
   0xc   :  { %v190_v8 = vpop.eup %189 }
   0xd   :  { %v192_v10 = vpop.eup %191  ;;  %v128_v12 = vmul.f32 %v190_v8, %v89_v6 }
   0xe   :  { %v194_v13 = vpop.eup %193  ;;  %v130_v15 = vmul.f32 %v192_v10, %v90_v7 }
   0xf   :  { %v196_v16 = vpop.eup %195  ;;  %v132_v18 = vmul.f32 %v194_v13, %v91_v9  ;;  %201 = vlog2.f32 %v128_v12 }
  0x10   :  { %v198_v19 = vpop.eup %197  ;;  %v134_v20 = vmul.f32 %v196_v16, %v92_v11  ;;  %203 = vlog2.f32 %v130_v15 }
  0x11   :  { %v200_v21 = vpop.eup %199  ;;  %v136_v22 = vmul.f32 %v198_v19, %v93_v14  ;;  %205 = vlog2.f32 %v132_v18 }
  0x12   :  { %v138_v23 = vmul.f32 %v200_v21, %v94_v17  ;;  %207 = vlog2.f32 %v134_v20 }
  0x13   :  { %209 = vlog2.f32 %v136_v22 }
  0x14   :  { %211 = vlog2.f32 %v138_v23 }
  0x19   :  { %v202_v24 = vpop.eup %201 }
  0x1a   :  { %v204_v25 = vpop.eup %203  ;;  %v140_v26 = vmul.f32 0.6931472, %v202_v24 }
  0x1b   :  { %v206_v27 = vpop.eup %205  ;;  %v142_v28 = vmul.f32 0.6931472, %v204_v25 }
  0x1c   :  { %v208_v29 = vpop.eup %207  ;;  %v144_v30 = vmul.f32 0.6931472, %v206_v27  ;;  %v151_v31 = vmul.f32 %v140_v26, %v89_v6 }
  0x1d   :  { %v210_v32 = vpop.eup %209  ;;  %v146_v33 = vmul.f32 0.6931472, %v208_v29  ;;  %v152_v34 = vmul.f32 %v142_v28, %v90_v7 }
  0x1e   :  { %v212_v35 = vpop.eup %211  ;;  %v148_v36 = vmul.f32 0.6931472, %v210_v32  ;;  %v153_v37 = vmul.f32 %v144_v30, %v91_v9  ;;  %v157_v38 = vsel %vm115_vm0, %v151_v31, 0.0 }
  0x1f   :  { %v150_v39 = vmul.f32 0.6931472, %v212_v35  ;;  %v154_v40 = vmul.f32 %v146_v33, %v92_v11  ;;  %v158_v41 = vsel %vm116_vm1, %v152_v34, 0.0 }
  0x20   :  { %v155_v42 = vmul.f32 %v148_v36, %v93_v14  ;;  %v159_v43 = vsel %vm117_vm2, %v153_v37, 0.0  ;;  %v163_v44 = vadd.f32 %v158_v41, %v157_v38 }
  0x21   :  { %v156_v45 = vmul.f32 %v150_v39, %v94_v17  ;;  %v160_v46 = vsel %vm118_vm3, %v154_v40, 0.0 }
  0x22   :  { %v164_v47 = vadd.f32 %v163_v44, %v159_v43  ;;  %v161_v48 = vsel %vm119_vm4, %v155_v42, 0.0 }
  0x23   :  { %v162_v50 = vsel %vm120_vm5, %v156_v45, 0.0 }
  0x24   :  { %v165_v49 = vadd.f32 %v164_v47, %v160_v46 }
  0x26   :  { %v166_v51 = vadd.f32 %v165_v49, %v161_v48 }
  0x28   :  { %v167_v52 = vadd.f32 %v166_v51, %v162_v50 }
  0x2a   :  { %171 = vst [vmem:[%s269_s2] sm:$0xff] %v167_v52 }

</bundles_post_ra>
